<compile_context>
chip_gen: v6e
topology: v6e:2x2x1
jax: 0.10.0
libtpu: 0.0.40
codegen_flags: <defaults>
</compile_context>

<pallas_src>
import jax
import jax.numpy as jnp
from jax.experimental import pallas as pl
from jax.experimental.pallas import tpu as pltpu


def _dsconv_kernel(xp_ref, wd_ref, bd_ref, wp_ref, bp_ref, o_ref):
    """One (batch, L-tile) grid step of fused depthwise + pointwise Conv1d.

    xp_ref : (C_in, L + 2P)   zero-padded input row (resident across L tiles)
    wd_ref : (C_in, K)        depthwise filters
    bd_ref : (C_in, 1)        depthwise bias
    wp_ref : (C_out, C_in)    pointwise (1x1 conv) weights
    bp_ref : (C_out, 1)       pointwise bias
    o_ref  : (C_out, TL)      lane-dense output tile
    """
    tl = o_ref.shape[-1]
    k_size = wd_ref.shape[-1]
    halo = k_size - 1                     # == 2 * (K // 2) for odd K

    j = pl.program_id(1)
    start = pl.multiple_of(j * tl, 128)   # lane-aligned tile start in padded x

    # Single wide load covering the tile plus its halo; taps are static slices.
    x_tile = xp_ref[:, pl.ds(start, tl + halo)].astype(jnp.float32)  # (C_in, TL+halo)
    wd = wd_ref[...].astype(jnp.float32)

    # Depthwise conv: K shifted multiply-adds on the VPU (f32 accumulation).
    acc = x_tile[:, 0:tl] * wd[:, 0:1]
    for k in range(1, k_size):
        acc = acc + x_tile[:, k:k + tl] * wd[:, k:k + 1]
    acc = acc + bd_ref[...].astype(jnp.float32)                      # (C_in, TL)

    # Pointwise 1x1 conv: channel-mixing matmul on the MXU.
    out = jnp.dot(wp_ref[...].astype(jnp.float32), acc,
                  preferred_element_type=jnp.float32)                # (C_out, TL)
    out = out + bp_ref[...].astype(jnp.float32)
    o_ref[...] = out.astype(o_ref.dtype)


def depthwise_separable_conv1d(x, wd, bd, wp, bp, *, tile_l=128):
    """x: (B, C_in, L); wd: (C_in, K); bd: (C_in,); wp: (C_out, C_in); bp: (C_out,).

    Equivalent to torch: pointwise(depthwise(x)) with padding=K//2, groups=C_in
    (odd K so L_out == L).
    """
    B, C_in, L = x.shape
    C_out = wp.shape[0]
    K = wd.shape[-1]
    assert K % 2 == 1, "odd kernel size keeps L_out == L (padding = K // 2)"
    P = K // 2

    # Lane-dense tiling over L (fall back to one full-L tile for tiny inputs).
    if L % tile_l != 0:
        tile_l = L
    n_l = L // tile_l

    # Zero-pad once in the wrapper (cheap XLA pad); kernel slices tile+halo windows.
    xp = jnp.pad(x, ((0, 0), (0, 0), (P, P)))
    Lp = L + 2 * P

    bd2 = bd.reshape(C_in, 1)
    bp2 = bp.reshape(C_out, 1)

    cost = pl.CostEstimate(
        flops=2 * B * C_in * K * L + 2 * B * C_in * C_out * L,
        transcendentals=0,
        bytes_accessed=(x.size + B * C_out * L) * x.dtype.itemsize
        + (wd.size + bd.size + wp.size + bp.size) * 4,
    )

    grid_spec = pltpu.PrefetchScalarGridSpec(
        num_scalar_prefetch=0,
        grid=(B, n_l),
        in_specs=[
            # Padded input row for batch b; block index ignores j -> fetched once
            # per batch and kept resident across all L tiles (single HBM read of x).
            pl.BlockSpec((None, C_in, Lp), lambda b, j: (b, 0, 0)),
            pl.BlockSpec((C_in, K), lambda b, j: (0, 0)),
            pl.BlockSpec((C_in, 1), lambda b, j: (0, 0)),
            pl.BlockSpec((C_out, C_in), lambda b, j: (0, 0)),
            pl.BlockSpec((C_out, 1), lambda b, j: (0, 0)),
        ],
        out_specs=pl.BlockSpec((None, C_out, tile_l), lambda b, j: (b, 0, j)),
    )

    return pl.pallas_call(
        _dsconv_kernel,
        out_shape=jax.ShapeDtypeStruct((B, C_out, L), x.dtype),
        grid_spec=grid_spec,
        compiler_params=pltpu.CompilerParams(
            dimension_semantics=("parallel", "arbitrary"),
            vmem_limit_bytes=32 * 1024 * 1024,  # safe on v5e/v6e/v7x; blocks are tiny
        ),
        cost_estimate=cost,
    )(xp, wd, bd2, wp, bp2)


def reference(x, wd, bd, wp, bp):
    """Pure-JAX reference matching torch Conv1d (cross-correlation) semantics."""
    K = wd.shape[-1]
    P = K // 2
    B, C, L = x.shape
    xp = jnp.pad(x, ((0, 0), (0, 0), (P, P)))
    dw = sum(xp[:, :, k:k + L] * wd[None, :, k, None] for k in range(K))
    dw = dw + bd[None, :, None]
    return jnp.einsum("oc,bct->bot", wp, dw) + bp[None, :, None]


if __name__ == "__main__":
    # DepthwiseSeparableConv1d(in_channels=32, out_channels=64, kernel_size=3)
    # L chosen as a multiple of 128 so the output tiles are lane-dense.
    B, C_in, C_out, L, K = 2, 32, 64, 256, 3

    key = jax.random.PRNGKey(0)
    kx, k1, k2, k3, k4 = jax.random.split(key, 5)

    x = jax.random.normal(kx, (B, C_in, L), dtype=jnp.float32)

    # torch-style uniform init scales (fan_in = K for depthwise, C_in for pointwise).
    s_dw = 1.0 / jnp.sqrt(K)
    s_pw = 1.0 / jnp.sqrt(C_in)
    wd = jax.random.uniform(k1, (C_in, K), jnp.float32, -s_dw, s_dw)
    bd = jax.random.uniform(k2, (C_in,), jnp.float32, -s_dw, s_dw)
    wp = jax.random.uniform(k3, (C_out, C_in), jnp.float32, -s_pw, s_pw)
    bp = jax.random.uniform(k4, (C_out,), jnp.float32, -s_pw, s_pw)

    out = depthwise_separable_conv1d(x, wd, bd, wp, bp)
    jax.block_until_ready(out)

    ref = reference(x, wd, bd, wp, bp)
    assert out.shape == (B, C_out, L)
    assert jnp.allclose(out, ref, atol=1e-4, rtol=1e-4), "mismatch vs pure-JAX reference"

    print("KERNEL_OK")
</pallas_src>

<mosaic_0001>
module attributes {stable_mosaic.version = 11 : i64} {
  func.func @_dsconv_kernel(%arg0: i32, %arg1: i32, %arg2: memref<1x32x258xf32, #tpu.memory_space<vmem>>, %arg3: memref<32x3xf32, #tpu.memory_space<vmem>>, %arg4: memref<32x1xf32, #tpu.memory_space<vmem>>, %arg5: memref<64x32xf32, #tpu.memory_space<vmem>>, %arg6: memref<64x1xf32, #tpu.memory_space<vmem>>, %arg7: memref<1x64x128xf32, #tpu.memory_space<vmem>>) attributes {dimension_semantics = [#tpu.dimension_semantics<parallel>, #tpu.dimension_semantics<arbitrary>], iteration_bounds = array<i64: 2, 2>, scalar_prefetch = 0 : i64, scratch_operands = 0 : i64, tpu.core_type = #tpu.core_type<tc>, window_params = [{transform_indices = @transform_0, window_bounds = array<i64: 1, 32, 258>}, {pipeline_mode = #tpu.pipeline_mode<synchronous>, transform_indices = @transform_1, window_bounds = array<i64: 32, 3>}, {pipeline_mode = #tpu.pipeline_mode<synchronous>, transform_indices = @transform_2, window_bounds = array<i64: 32, 1>}, {pipeline_mode = #tpu.pipeline_mode<synchronous>, transform_indices = @transform_3, window_bounds = array<i64: 64, 32>}, {pipeline_mode = #tpu.pipeline_mode<synchronous>, transform_indices = @transform_4, window_bounds = array<i64: 64, 1>}, {transform_indices = @transform_5, window_bounds = array<i64: 1, 64, 128>}]} {
    %c128_i32 = arith.constant 128 : i32
    %0 = arith.muli %arg1, %c128_i32 : i32
    %1 = tpu.assume_multiple %0, 128 : i32
    %c0 = arith.constant 0 : index
    %c0_0 = arith.constant 0 : index
    %2 = arith.index_cast %1 : i32 to index
    %3 = vector.load %arg2[%c0, %c0_0, %2] : memref<1x32x258xf32, #tpu.memory_space<vmem>>, vector<1x32x130xf32>
    %4 = vector.shape_cast %3 : vector<1x32x130xf32> to vector<32x130xf32>
    %c0_1 = arith.constant 0 : index
    %c0_2 = arith.constant 0 : index
    %5 = vector.load %arg3[%c0_1, %c0_2] : memref<32x3xf32, #tpu.memory_space<vmem>>, vector<32x3xf32>
    %6 = vector.extract_strided_slice %4 {offsets = [0, 0], sizes = [32, 128], strides = [1, 1]} : vector<32x130xf32> to vector<32x128xf32>
    %7 = vector.extract_strided_slice %5 {offsets = [0, 0], sizes = [32, 1], strides = [1, 1]} : vector<32x3xf32> to vector<32x1xf32>
    %8 = vector.broadcast %7 : vector<32x1xf32> to vector<32x128xf32>
    %9 = arith.mulf %6, %8 : vector<32x128xf32>
    %10 = vector.extract_strided_slice %4 {offsets = [0, 1], sizes = [32, 128], strides = [1, 1]} : vector<32x130xf32> to vector<32x128xf32>
    %11 = vector.extract_strided_slice %5 {offsets = [0, 1], sizes = [32, 1], strides = [1, 1]} : vector<32x3xf32> to vector<32x1xf32>
    %12 = vector.broadcast %11 : vector<32x1xf32> to vector<32x128xf32>
    %13 = arith.mulf %10, %12 : vector<32x128xf32>
    %14 = arith.addf %9, %13 : vector<32x128xf32>
    %15 = vector.extract_strided_slice %4 {offsets = [0, 2], sizes = [32, 128], strides = [1, 1]} : vector<32x130xf32> to vector<32x128xf32>
    %16 = vector.extract_strided_slice %5 {offsets = [0, 2], sizes = [32, 1], strides = [1, 1]} : vector<32x3xf32> to vector<32x1xf32>
    %17 = vector.broadcast %16 : vector<32x1xf32> to vector<32x128xf32>
    %18 = arith.mulf %15, %17 : vector<32x128xf32>
    %19 = arith.addf %14, %18 : vector<32x128xf32>
    %c0_3 = arith.constant 0 : index
    %c0_4 = arith.constant 0 : index
    %20 = vector.load %arg4[%c0_3, %c0_4] : memref<32x1xf32, #tpu.memory_space<vmem>>, vector<32x1xf32>
    %21 = vector.broadcast %20 : vector<32x1xf32> to vector<32x128xf32>
    %22 = arith.addf %19, %21 : vector<32x128xf32>
    %c0_5 = arith.constant 0 : index
    %c0_6 = arith.constant 0 : index
    %23 = vector.load %arg5[%c0_5, %c0_6] : memref<64x32xf32, #tpu.memory_space<vmem>>, vector<64x32xf32>
    %cst = arith.constant dense<0.000000e+00> : vector<64x128xf32>
    %24 = tpu.matmul %23, %22, %cst {dimension_numbers = #tpu.dot_dimension_numbers<[1], [0], [0], [1], [0, 0, 1, 1], [], []>} : vector<64x32xf32>, vector<32x128xf32>, vector<64x128xf32> -> vector<64x128xf32>
    %c0_7 = arith.constant 0 : index
    %c0_8 = arith.constant 0 : index
    %25 = vector.load %arg6[%c0_7, %c0_8] : memref<64x1xf32, #tpu.memory_space<vmem>>, vector<64x1xf32>
    %26 = vector.broadcast %25 : vector<64x1xf32> to vector<64x128xf32>
    %27 = arith.addf %24, %26 : vector<64x128xf32>
    %c0_9 = arith.constant 0 : index
    %c0_10 = arith.constant 0 : index
    %c0_11 = arith.constant 0 : index
    %28 = vector.load %arg7[%c0_9, %c0_10, %c0_11] : memref<1x64x128xf32, #tpu.memory_space<vmem>>, vector<1x64x128xf32>
    %29 = vector.shape_cast %28 : vector<1x64x128xf32> to vector<64x128xf32>
    %30 = vector.shape_cast %27 : vector<64x128xf32> to vector<1x64x128xf32>
    tpu.vector_store %arg7[%c0_9, %c0_10, %c0_11], %30 {strides = array<i32>} : memref<1x64x128xf32, #tpu.memory_space<vmem>>, vector<1x64x128xf32>,
    return
  }
  func.func @transform_0(%arg0: i32, %arg1: i32) -> (i32, i32, i32) {
    %c0_i32 = arith.constant 0 : i32
    %c0_i32_0 = arith.constant 0 : i32
    %c0_i32_1 = arith.constant 0 : i32
    return %arg0, %c0_i32, %c0_i32_0 : i32, i32, i32
  }
  func.func @transform_1(%arg0: i32, %arg1: i32) -> (i32, i32) {
    %c0_i32 = arith.constant 0 : i32
    %c0_i32_0 = arith.constant 0 : i32
    %c0_i32_1 = arith.constant 0 : i32
    return %c0_i32, %c0_i32_0 : i32, i32
  }
  func.func @transform_2(%arg0: i32, %arg1: i32) -> (i32, i32) {
    %c0_i32 = arith.constant 0 : i32
    %c0_i32_0 = arith.constant 0 : i32
    %c0_i32_1 = arith.constant 0 : i32
    return %c0_i32, %c0_i32_0 : i32, i32
  }
  func.func @transform_3(%arg0: i32, %arg1: i32) -> (i32, i32) {
    %c0_i32 = arith.constant 0 : i32
    %c0_i32_0 = arith.constant 0 : i32
    %c0_i32_1 = arith.constant 0 : i32
    return %c0_i32, %c0_i32_0 : i32, i32
  }
  func.func @transform_4(%arg0: i32, %arg1: i32) -> (i32, i32) {
    %c0_i32 = arith.constant 0 : i32
    %c0_i32_0 = arith.constant 0 : i32
    %c0_i32_1 = arith.constant 0 : i32
    return %c0_i32, %c0_i32_0 : i32, i32
  }
  func.func @transform_5(%arg0: i32, %arg1: i32) -> (i32, i32, i32) {
    %c0_i32 = arith.constant 0 : i32
    %c0_i32_0 = arith.constant 0 : i32
    return %arg0, %c0_i32, %arg1 : i32, i32, i32
  }
}

</mosaic_0001>

<bundles_post_ra>
// kernel: tpu_custom_call.1
= control target key start
LH: loop header
LB: loop body
LE: loop exit
PB: predicated region body
PF: predicated region fallthrough
CT: control target
= control target key end

     0   :  { %s1272_s0 = inlined_call_operand.vmem [shape: f32[2,32,258], index: 0, kind: input, shape index: {}]   ;;  %s1273_s1 = inlined_call_operand.vmem [shape: f32[32,3], index: 1, kind: input, shape index: {}]   ;;  %s1274_s2 = inlined_call_operand.vmem [shape: f32[32,1], index: 2, kind: input, shape index: {}]   ;;  %s1275_s3 = inlined_call_operand.vmem [shape: f32[64,32], index: 3, kind: input, shape index: {}]   ;;  %s1276_s4 = inlined_call_operand.vmem [shape: f32[64,1], index: 4, kind: input, shape index: {}]   ;;  %s1277_s5 = inlined_call_operand.hbm [shape: f32[2,64,256], index: 5, kind: output, shape index: {}]  }
   0x1   :  { %1278 = sst [smem:[#allocation5_spill]] %s1273_s1 }
   0x2   :  { %10 = vsyncpa [#allocation3], 0 }
   0x3   :  { %12 = vsyncpa [#allocation3 + $0x1], 0  ;;  %s996_s18 = smov 0   ;;  %s998_s19 = smov 0  }
   0x4   :  { %s1000_s20 = smov 0   ;;  %s1002_s21 = smov 0  }
   0x5   :  { %s1004_s22 = smov 0   ;;  %s1006_s23 = smov 0  }
   0x6   :  { %s1008_s24 = smov 0   ;;  %s1010_s25 = smov 0  }
   0x7 LB: > { %s714_s26 = sadd.s32 4294967295, %s955_s25   ;;  %s715_s27 = sadd.s32 4294967294, %s955_s25   ;;  %s955_s25 = sphi %s1010_s25, %s18_s25   ;;  %s951_s24 = sphi %s1008_s24, %s1288_s24   ;;  %s947_s23 = sphi %s1006_s23, %s1287_s23   ;;  %s943_s22 = sphi %s1004_s22, %s1286_s22   ;;  %s939_s21 = sphi %s1002_s21, %s1285_s21   ;;  %s935_s20 = sphi %s1000_s20, %s1284_s20   ;;  %s931_s19 = sphi %s998_s19, %s1283_s19   ;;  %s927_s18 = sphi %s996_s18, %s1282_s18  }
   0x8   : > { %s27_s28 = sadd.s32 1, %s947_s23  ;;  %s30_s29 = sadd.s32 1, %s951_s24 }
   0x9   : > { %p28_p0 = scmp.ge.s32.totalorder %s27_s28, 2  ;;  %p159_p1 = scmp.ne.s32.totalorder %s935_s20, %s931_s19 }
   0xa   : > { %p160_p2 = scmp.eq.s32.totalorder %s714_s26, 3  ;;  %p165_p5 = scmp.ne.s32.totalorder %s931_s19, %s927_s18 }
   0xb   : > { %s1290_s28 = smov (%p28_p0, %s27_s28), 0  ;;  %s1292_s29 = smov (!%p28_p0, %s30_s29), %s951_s24 }
   0xc   : > { %s145_s30 = ssub.s32 %s947_s23, %s1290_s28  ;;  %p1047_p3 = por %p160_p2, %p159_p1 }
   0xd   : > { %p32_p4 = scmp.ge.s32.totalorder %s1292_s29, 2  ;;  %p166_p6 = scmp.eq.s32.totalorder %s715_s27, 3 }
   0xe   : > { %p718_p7 = scmp.ge.s32.totalorder %s955_s25, 1  ;;  %p204_p9 = scmp.lt.s32.totalorder %s955_s25, 5 }
   0xf   : > { %s1294_s29 = smov (%p32_p4, %s1292_s29), 0  ;;  %p1056_p8 = por %p166_p6, %p165_p5 }
  0x10   : > { %s144_s8 = ssub.s32 %s951_s24, %s1294_s29  ;;  %s149_s9 = sadd.s32 1, %s935_s20 }
  0x11   : > { %s146_s10 = sor.u32 %s145_s30, %s144_s8  ;;  %p205_p10 = pnand %p718_p7, %p204_p9 }
  0x12   : > { %p147_p11 = scmp.eq.s32.totalorder %s146_s10, 0  ;;  %s1281_s1 = sld [smem:[#allocation5_spill]] (!%p205_p10) }
  0x13   : > { %208 = sbr.rel (%p205_p10) target bundleno = 518 (0x206), region = 40  ;;  %p232_p12 = scmp.lt.s32.totalorder (!%p205_p10), %s943_s22, 1 }
  0x14   : > { %s1065_s11 = scalar_select %p147_p11, %s935_s20, %s149_s9  }
  0x15   : > { %s721_s17 = sshll.u32 (!%p205_p10), %s939_s21, 7  ;;  %s960_s12 = smov (!%p205_p10), 127  }
  0x16   : > { %s238_s27 = sshra.s32 (!%p205_p10), %s721_s17, 7  ;;  %s961_s13 = smov (!%p205_p10), 126  }
  0x17   : > { %s722_s10 = sshll.u32 (!%p205_p10), %s238_s27, 3  ;;  %s229_s27 = sand.u32 (!%p205_p10), 1, %s931_s19  }
  0x18   : > { %v253_v0 = vld [vmem:[%s1281_s1 + $0x18] sm:$0xff]  ;;  %v957_v1 = vmov 1   ;;  %v958_v2 = vmov 2   ;;  %v252_v3 = vld [vmem:[%s1281_s1 + $0x10] sm:$0xff]  ;;  %v251_v4 = vld [vmem:[%s1281_s1 + $0x8] sm:$0xff]  ;;  %v959_v6 = vmov 0  }
  0x19   : > { %856 = vset.pattern.permute.xlu0 %v957_v1  ;;  %857 = vset.pattern.permute.xlu1 %v958_v2  ;;  %v250_v5 = vld [vmem:[%s1281_s1] sm:$0xff]  ;;  %v403_v7 = vld [vmem:[%s1274_s2 + $0x18] sm:$0xff]  ;;  %v401_v8 = vld [vmem:[%s1274_s2 + $0x8] sm:$0xff]  ;;  %s233_s16 = scalar_select %p232_p12, %s943_s22, 1  ;;  %vm484_vm0 = vcmask 261120   ;;  %vm326_vm1 = vcmask 1039360  }
  0x1a   : > { %291 = vperm.xlu0 %856, %v253_v0   ;;  %352 = vperm.xlu1 %857, %v253_v0   ;;  %v402_v9 = vld [vmem:[%s1274_s2 + $0x10] sm:$0xff]  ;;  %v400_v10 = vld [vmem:[%s1274_s2] sm:$0xff]  ;;  %v437_v46 = vld [vmem:[%s1276_s4 + $0x8] sm:$0xff]  ;;  %vm387_vm2 = vcmask 1031168   ;;  %s719_s30 = sshll.u32 %s229_s27, 6  ;;  %s732_s8 = sshll.u32 %s943_s22, 4 }
  0x1b   : > { %s776_s26 = smul.u32 96, %s233_s16  ;;  %v428_v40 = vld [vmem:[%s1275_s3] sm:$0xff]  ;;  %v438_v47 = vld [vmem:[%s1276_s4 + $0x10] sm:$0xff]  ;;  %v439_v48 = vld [vmem:[%s1276_s4 + $0x18] sm:$0xff]  ;;  %s1221_s15 = scalar_lea.sflag [#allocation3], %s229_s27 }
  0x1c   : > { %v432_v41 = vld [vmem:[%s1275_s3 + $0x20] sm:$0xff]  ;;  %756 = vmatprep.mubr.msk.f32.mxu0 %vm484_vm0, %v428_v40  ;;  %v441_v50 = vld [vmem:[%s1276_s4 + $0x28] sm:$0xff]  ;;  %v442_v51 = vld [vmem:[%s1276_s4 + $0x30] sm:$0xff]  ;;  %s962_s16 = smov [#allocation2]  }
  0x1d   : > { %s236_s9 = scalar_lea.vmem %s1272_s0, %s776_s26  ;;  %762 = vmatprep.mubr.msk.f32.mxu1 %vm484_vm0, %v432_v41  ;;  %v436_v45 = vld [vmem:[%s1276_s4] sm:$0xff]  ;;  %v443_v52 = vld [vmem:[%s1276_s4 + $0x38] sm:$0xff]  ;;  %v434_v40 = vld [vmem:[%s1275_s3 + $0x30] sm:$0xff]  ;;  %s867_s17 = sshll.u32 %s962_s16, 4  ;;  %s868_s17 = int_to_ptr.vmem [resolvable:$false] %s867_s17 }
  0x1e   : > { %287 = vperm.xlu0 %856, %v252_v3   ;;  %858 = vset.pattern.permute.xlu1 %v957_v1  ;;  %s1097_s1 = scalar_lea.vmem %s236_s9, %s722_s10  ;;  %v440_v49 = vld [vmem:[%s1276_s4 + $0x20] sm:$0xff]  ;;  %v431_v41 = vld [vmem:[%s1275_s3 + $0x18] sm:$0xff]  ;;  %s634_s9 = sadd.s32 %s939_s21, %s732_s8 }
  0x1f   : > { %283 = vperm.xlu1 %858, %v251_v4   ;;  %v1100_v11 = vld [vmem:[%s1097_s1 + $0x48] sm:$0xff]  ;;  %v249_v12 = vld [vmem:[%s1097_s1 + $0x50] sm:$0xff]  ;;  %v247_v17 = vld [vmem:[%s1097_s1 + $0x38] sm:$0xff]  ;;  %s231_s10 = scalar_lea.vmem [#allocation2], %s719_s30  ;;  %s869_s26 = scalar_lea.vmem %s868_s17, 2048 }
  0x20   : > { %v1105_v16 = vld [vmem:[%s1097_s1 + $0x30] sm:$0xff]  ;;  %v1115_v24 = vld [vmem:[%s1097_s1 + $0x18] sm:$0xff]  ;;  %v245_v25 = vld [vmem:[%s1097_s1 + $0x20] sm:$0xff] }
  0x21   : > { %v1125_v33 = vld [vmem:[%s1097_s1] sm:$0xff]  ;;  %v243_v34 = vld [vmem:[%s1097_s1 + $0x8] sm:$0xff] }
  0x22   : > { %859 = vset.pattern.permute.xlu0 %v958_v2 }
  0x23   : > { %348 = vperm.xlu0 %859, %v252_v3   ;;  %279 = vperm.xlu1 %858, %v250_v5  }
  0x27   : > { %340 = vperm.xlu0 %859, %v250_v5   ;;  %860 = vset.pattern.permute.xlu1 %v958_v2 }
  0x28   : > { %344 = vperm.xlu1 %860, %v251_v4  }
  0x2b   : > { %862 = vset.pattern.permute.xlu0 %v959_v6 }
  0x2c   : > { %861 = vset.pattern.permute.xlu1 %v959_v6  ;;  %266 = vperm.xlu0 %862, %v252_v3  }
  0x2d   : > { %271 = vperm.xlu1 %861, %v253_v0  }
  0x30   : > { %421 = vperm.xlu0 %862, %v403_v7  }
  0x31   : > { %261 = vperm.xlu1 %861, %v251_v4  }
  0x34   : > { %411 = vperm.xlu0 %862, %v401_v8  }
  0x35   : > { %256 = vperm.xlu1 %861, %v250_v5  }
  0x39   : > { %416 = vperm.xlu1 %861, %v402_v9  }
  0x3d   : > { %406 = vperm.xlu1 %861, %v400_v10  }
  0x95   : > { %v292_v13 = vpop.permute.xlu0 %291  ;;  %v353_v18 = vpop.permute.xlu1 %352 }
  0x96   : > { %v300_v14 = vmul.f32 %v292_v13, %v1100_v11  ;;  %v301_v15 = vmul.f32 %v292_v13, %v249_v12  ;;  %v361_v22 = vmul.f32 %v353_v18, %v1100_v11  ;;  %v362_v23 = vmul.f32 %v353_v18, %v249_v12 }
  0x98   : > { %324 = vrot.lane.b32.xlu1 %v301_v15, %s960_s12  ;;  %322 = vrot.lane.b32.xlu0 %v300_v14, %s960_s12 }
  0x99   : > { %v288_v19 = vpop.permute.xlu0 %287 }
  0x9a   : > { %v298_v20 = vmul.f32 %v288_v19, %v1105_v16  ;;  %v299_v21 = vmul.f32 %v288_v19, %v247_v17  ;;  %v284_v26 = vpop.permute.xlu1 %283 }
  0x9b   : > { %v296_v27 = vmul.f32 %v284_v26, %v1115_v24  ;;  %v297_v28 = vmul.f32 %v284_v26, %v245_v25 }
  0x9c   : > { %320 = vrot.lane.b32.xlu0 %v299_v21, %s960_s12  ;;  %318 = vrot.lane.b32.xlu1 %v298_v20, %s960_s12 }
  0x9e   : > { %v349_v29 = vpop.permute.xlu0 %348  ;;  %v280_v32 = vpop.permute.xlu1 %279 }
  0x9f   : > { %v359_v30 = vmul.f32 %v349_v29, %v1105_v16  ;;  %v360_v31 = vmul.f32 %v349_v29, %v247_v17  ;;  %v294_v36 = vmul.f32 %v280_v32, %v1125_v33  ;;  %v295_v37 = vmul.f32 %v280_v32, %v243_v34 }
  0xa0   : > { %385 = vrot.lane.b32.xlu0 %v362_v23, %s961_s13  ;;  %383 = vrot.lane.b32.xlu1 %v361_v22, %s961_s13 }
  0xa2   : > { %v341_v42 = vpop.permute.xlu0 %340 }
  0xa3   : > { %v345_v35 = vpop.permute.xlu1 %344  ;;  %v355_v43 = vmul.f32 %v341_v42, %v1125_v33  ;;  %v356_v44 = vmul.f32 %v341_v42, %v243_v34  ;;  %v435_v42 = vld [vmem:[%s1275_s3 + $0x38] sm:$0xff] }
  0xa4   : > { %316 = vrot.lane.b32.xlu1 %v297_v28, %s960_s12  ;;  %314 = vrot.lane.b32.xlu0 %v296_v27, %s960_s12  ;;  %v357_v38 = vmul.f32 %v345_v35, %v1115_v24  ;;  %v358_v39 = vmul.f32 %v345_v35, %v245_v25 }
  0xa7   : > { %v267_v56 = vpop.permute.xlu0 %266 }
  0xa8   : > { %381 = vrot.lane.b32.xlu1 %v360_v31, %s961_s13  ;;  %379 = vrot.lane.b32.xlu0 %v359_v30, %s961_s13  ;;  %v272_v53 = vpop.permute.xlu1 %271  ;;  %v276_v13 = vmul.f32 %v267_v56, %v1105_v16 }
  0xa9   : > { %v277_v2 = vmul.f32 %v272_v53, %v1100_v11 }
  0xab   : > { %v422_v58 = vpop.permute.xlu0 %421 }
  0xac   : > { %312 = vrot.lane.b32.xlu0 %v295_v37, %s960_s12  ;;  %310 = vrot.lane.b32.xlu1 %v294_v36, %s960_s12  ;;  %v262_v54 = vpop.permute.xlu1 %261  ;;  %s637_s12 = sshll.u32 %s231_s10, 4  ;;  %s1212_s12 = int_to_ptr.vmem [resolvable:$true] %s637_s12 }
  0xad   : > { %v275_v23 = vmul.f32 %v262_v54, %v1115_v24  ;;  %s863_s1 = scalar_lea.vmem %s1212_s12, 1024  ;;  %p870_p2 = scmp.lt.s32.totalorder %s1212_s12, %s868_s17 }
  0xae   : > { %p864_p13 = scmp.ne.s32.totalorder %s1212_s12, %s863_s1  ;;  %p871_p4 = scmp.lt.s32.totalorder %s869_s26, %s863_s1 }
  0xaf   : > { %v412_v60 = vpop.permute.xlu0 %411 }
  0xb0   : > { %377 = vrot.lane.b32.xlu0 %v358_v39, %s961_s13  ;;  %375 = vrot.lane.b32.xlu1 %v357_v38, %s961_s13  ;;  %v257_v55 = vpop.permute.xlu1 %256  ;;  %v429_v38 = vld [vmem:[%s1275_s3 + $0x8] sm:$0xff]  ;;  %v430_v39 = vld [vmem:[%s1275_s3 + $0x10] sm:$0xff]  ;;  %p865_p0 = pnand %p864_p13, %p1047_p3  ;;  %p872_p5 = por %p871_p4, %p870_p2 }
  0xb1   : > { %v274_v29 = vmul.f32 %v257_v55, %v1125_v33  ;;  %v433_v33 = vld [vmem:[%s1275_s3 + $0x28] sm:$0xff] }
  0xb2   : > { %p866_p1 = pneg %p865_p0 }
  0xb4   : > { %371 = vrot.lane.b32.xlu0 %v355_v43, %s961_s13  ;;  %373 = vrot.lane.b32.xlu1 %v356_v44, %s961_s13  ;;  %v417_v57 = vpop.permute.xlu1 %416  ;;  %s733_s13 = sshll.u32 %s634_s9, 7  ;;  %p873_p6 = pnand %p872_p5, %p866_p1 }
  0xb5   : > { %s1217_s14 = scalar_lea.hbm %s1277_s5, %s733_s13 }
  0xb8   : > { %446 = vperm.xlu0 %862, %v436_v45   ;;  %451 = vperm.xlu1 %861, %v437_v46   ;;  %v407_v59 = vpop.permute.xlu1 %406 }
  0xbc   : > { %456 = vperm.xlu0 %862, %v438_v47   ;;  %461 = vperm.xlu1 %861, %v439_v48  }
  0xc0   : > { %466 = vperm.xlu0 %862, %v440_v49   ;;  %471 = vperm.xlu1 %861, %v441_v50  }
  0xc4   : > { %476 = vperm.xlu0 %862, %v442_v51   ;;  %481 = vperm.xlu1 %861, %v443_v52  }
 0x10a   : > { %v325_v61 = vpop.permute.xlu1 %324  ;;  %v323_v62 = vpop.permute.xlu0 %322 }
 0x10b   : > { %v330_v1 = vsel %vm326_vm1, %v323_v62, %v325_v61 }
 0x10c   : > { %v338_v3 = vadd.f32 %v330_v1, %v277_v2 }
 0x10e   : > { %v321_v63 = vpop.permute.xlu0 %320  ;;  %v319_v0 = vpop.permute.xlu1 %318 }
 0x10f   : > { %v329_v12 = vsel %vm326_vm1, %v319_v0, %v321_v63 }
 0x110   : > { %v337_v14 = vadd.f32 %v329_v12, %v276_v13 }
 0x112   : > { %v386_v4 = vpop.permute.xlu0 %385  ;;  %v384_v5 = vpop.permute.xlu1 %383 }
 0x113   : > { %v391_v6 = vsel %vm387_vm2, %v384_v5, %v386_v4 }
 0x114   : > { %v399_v7 = vadd.f32 %v391_v6, %v338_v3 }
 0x116   : > { %v427_v8 = vadd.f32 %v422_v58, %v399_v7  ;;  %v317_v9 = vpop.permute.xlu1 %316  ;;  %v315_v10 = vpop.permute.xlu0 %314 }
 0x117   : > { %v328_v22 = vsel %vm326_vm1, %v315_v10, %v317_v9 }
 0x118   : > { %748 = vmatprep.subr.mxu0 %v427_v8  ;;  %768 = vmatprep.subr.mxu1 %v427_v8  ;;  %v336_v16 = vadd.f32 %v328_v22, %v275_v23 }
 0x119   : > { %749 = vmatpush3.msra.mxu0 %v427_v8  ;;  %772 = vmatpush3.msra.mxu1 %v427_v8 }
 0x11a   : > { %v382_v11 = vpop.permute.xlu1 %381  ;;  %v380_v15 = vpop.permute.xlu0 %379 }
 0x11b   : > { %v390_v17 = vsel %vm387_vm2, %v380_v15, %v382_v11 }
 0x11c   : > { %v398_v18 = vadd.f32 %v390_v17, %v337_v14 }
 0x11e   : > { %v426_v19 = vadd.f32 %v417_v57, %v398_v18  ;;  %v313_v20 = vpop.permute.xlu0 %312  ;;  %v311_v21 = vpop.permute.xlu1 %310 }
 0x11f   : > { %v327_v27 = vsel %vm326_vm1, %v311_v21, %v313_v20 }
 0x120   : > { %750 = vmatprep.subr.mxu0 %v426_v19  ;;  %769 = vmatprep.subr.mxu1 %v426_v19  ;;  %v335_v31 = vadd.f32 %v327_v27, %v274_v29 }
 0x121   : > { %751 = vmatpush3.msra.mxu0 %v426_v19  ;;  %773 = vmatpush3.msra.mxu1 %v426_v19 }
 0x122   : > { %v378_v25 = vpop.permute.xlu0 %377  ;;  %v376_v26 = vpop.permute.xlu1 %375 }
 0x123   : > { %v389_v28 = vsel %vm387_vm2, %v376_v26, %v378_v25 }
 0x124   : > { %v397_v30 = vadd.f32 %v389_v28, %v336_v16 }
 0x126   : > { %v425_v32 = vadd.f32 %v412_v60, %v397_v30  ;;  %v372_v34 = vpop.permute.xlu0 %371  ;;  %v374_v35 = vpop.permute.xlu1 %373 }
 0x127   : > { %v388_v24 = vsel %vm387_vm2, %v372_v34, %v374_v35 }
 0x128   : > { %v396_v36 = vadd.f32 %v388_v24, %v335_v31  ;;  %752 = vmatprep.subr.mxu0 %v425_v32  ;;  %770 = vmatprep.subr.mxu1 %v425_v32 }
 0x129   : > { %753 = vmatpush3.msra.mxu0 %v425_v32  ;;  %774 = vmatpush3.msra.mxu1 %v425_v32 }
 0x12a   : > { %v424_v37 = vadd.f32 %v407_v59, %v396_v36 }
 0x12c   : > { %754 = vmatprep.subr.mxu0 %v424_v37  ;;  %771 = vmatprep.subr.mxu1 %v424_v37 }
 0x12d   : > { %755 = vmatpush3.msra.mxu0 %v424_v37  ;;  %775 = vmatpush3.msra.mxu1 %v424_v37 }
 0x12e   : > { %757 = vmatmul.mubr.msk.f32.vlgmr.msra.gmra.mxu0 %vm484_vm0, %v429_v38  ;;  %763 = vmatmul.mubr.msk.f32.vlgmr.msra.gmra.mxu1 %vm484_vm0, %v433_v33 }
 0x12f   : > { %759 = vmatprep.mubr.msk.f32.mxu0 %vm484_vm0, %v430_v39  ;;  %765 = vmatprep.mubr.msk.f32.mxu1 %vm484_vm0, %v434_v40 }
 0x132   : > { %760 = vmatmul.mubr.msk.f32.gmra.mxu0 %vm484_vm0, %v431_v41  ;;  %766 = vmatmul.mubr.msk.f32.gmra.mxu1 %vm484_vm0, %v435_v42 }
 0x133   : > { %v452_v43 = vpop.permute.xlu1 %451  ;;  %v447_v44 = vpop.permute.xlu0 %446 }
 0x137   : > { %v462_v45 = vpop.permute.xlu1 %461  ;;  %v457_v46 = vpop.permute.xlu0 %456 }
 0x13b   : > { %v472_v47 = vpop.permute.xlu1 %471  ;;  %v467_v48 = vpop.permute.xlu0 %466 }
 0x13f   : > { %v482_v55 = vpop.permute.xlu1 %481  ;;  %v477_v60 = vpop.permute.xlu0 %476 }
 0x1ee   : > { %v758_v49 = vpop.f32.mrf.mxu0  ;;  %v764_v50 = vpop.f32.mrf.mxu1 }
 0x1ef   : > { %v581_v51 = vadd.f32 %v758_v49, %v452_v43  ;;  %v601_v52 = vadd.f32 %v764_v50, %v472_v47 }
 0x1f0   : > { %v575_v53 = vpop.f32.mrf.mxu0  ;;  %v595_v54 = vpop.f32.mrf.mxu1 }
 0x1f1   : > { %615 = vst [vmem:[%s231_s10 + $0x8] sm:$0xff] %v581_v51  ;;  %619 = vst [vmem:[%s231_s10 + $0x28] sm:$0xff] %v601_v52  ;;  %v576_v56 = vadd.f32 %v575_v53, %v447_v44  ;;  %v596_v57 = vadd.f32 %v595_v54, %v467_v48 }
 0x1f2   : > { %v761_v58 = vpop.f32.mrf.mxu0  ;;  %v767_v59 = vpop.f32.mrf.mxu1 }
 0x1f3   : > { %614 = vst [vmem:[%s231_s10] sm:$0xff] %v576_v56  ;;  %618 = vst [vmem:[%s231_s10 + $0x20] sm:$0xff] %v596_v57  ;;  %v591_v61 = vadd.f32 %v761_v58, %v462_v45  ;;  %v611_v62 = vadd.f32 %v767_v59, %v482_v55 }
 0x1f4   : > { %v585_v63 = vpop.f32.mrf.mxu0  ;;  %v605_v0 = vpop.f32.mrf.mxu1 }
 0x1f5   : > { %617 = vst [vmem:[%s231_s10 + $0x18] sm:$0xff] %v591_v61  ;;  %621 = vst [vmem:[%s231_s10 + $0x38] sm:$0xff] %v611_v62  ;;  %v586_v1 = vadd.f32 %v585_v63, %v457_v46  ;;  %v606_v2 = vadd.f32 %v605_v0, %v477_v60 }
 0x1f7   : > { %616 = vst [vmem:[%s231_s10 + $0x10] sm:$0xff] %v586_v1  ;;  %620 = vst [vmem:[%s231_s10 + $0x30] sm:$0xff] %v606_v2 }
 0x1f8   : > { %876 = shalt.err (!%p873_p6)
}
 0x1f9   : > { %s877_s27 = scalar_lea.hbm %s1217_s14, 1024  ;;  %s881_s9 = scalar_lea.hbm %s1277_s5, 4096 }
 0x1fa   : > { %p878_p7 = scmp.ne.s32.totalorder %s1217_s14, %s877_s27  ;;  %p882_p11 = scmp.lt.s32.totalorder %s1217_s14, %s1277_s5 }
 0x1fb   : > { %p883_p12 = scmp.lt.s32.totalorder %s881_s9, %s877_s27 }
 0x1fc   : > { %p879_p9 = pnand %p878_p7, %p1047_p3 }
 0x1fd   : > { %p884_p13 = por %p883_p12, %p882_p11 }
 0x1fe   : > { %p880_p10 = pneg %p879_p9 }
 0x200   : > { %p885_p0 = pnand %p884_p13, %p880_p10 }
 0x202   : > { %888 = shalt.err (!%p885_p0)
}
 0x203   : > { %s963_s21 = smov 128   ;;  %s964_s22 = smov 256  }
 0x204   : > { %s965_s1 = smov 8  }
 0x205   : > { %777 = dma.vmem_to_hbm [thread:$0]  (%p1047_p3), %s1212_s12, 1024, %s1217_s14, %s1221_s15, %s963_s21, %s964_s22, %s965_s1  }
 0x206 PF: > { %p783_p1 = scmp.ge.s32.totalorder %s955_s25, 2  ;;  %s652_s16 = sand.u32 1, %s927_s18  }
 0x207   : > { %s653_s17 = scalar_lea.sflag [#allocation3], %s652_s16 }
 0x208   : > { %p780_p2 = pnand %p783_p1, %p1056_p8 }
 0x20a   : > { %p781_p4 = pneg %p780_p2 }
 0x20c   : > { %922 = dma.done.wait (%p781_p4), %s653_s17, 1024  }
 0x20d   : > { %924 = vsyncadd (%p781_p4), %s653_s17, 4294966272  ;;  %s18_s25 = sadd.s32 1, %s955_s25   ;;  %s1282_s18 = smov %s931_s19 }
 0x20e   : > { %p15_p5 = scmp.ge.s32.totalorder %s18_s25, 6   ;;  %s1283_s19 = smov %s935_s20 }
 0x20f   : > { %s1284_s20 = smov %s1065_s11  ;;  %s1285_s21 = smov %s947_s23 }
 0x210   : > { %s1286_s22 = smov %s951_s24  ;;  %s1287_s23 = smov %s1290_s28 }
 0x211   : > { %s1288_s24 = smov %s1294_s29  ;;  %17 = sbr.rel (!%p15_p5) target bundleno = 7 (0x7), region = 76 }
 0x216   :  { %658 = vsyncpa [#allocation3], 1 }
 0x217   :  { %660 = vsyncpa [#allocation3 + $0x1], 1 }

</bundles_post_ra>
